<compile_context>
chip_gen: v7x
topology: tpu7x:2x2x1
jax: 0.10.0
libtpu: 0.0.40
codegen_flags: <defaults>
</compile_context>

<pallas_src>
import jax
import jax.numpy as jnp
from jax.experimental import pallas as pl
from jax.experimental.pallas import tpu as pltpu


def _copy_kernel(x_ref, o_ref):
    # Identity data movement: the entirety of UnFlatten's "compute".
    o_ref[...] = x_ref[...]


_LANE = 128
_SUBLANE = 8
_MAX_LANE_WIDTH = 4096          # slab width cap (multiple of 128, lane-dense)
_MIB = 1024 * 1024


def _vmem_capacity_bytes():
    """Trace-time per-chip VMEM size; conservative 64 MiB fallback (v7x)."""
    try:
        info = pltpu.get_tpu_info()
        for attr in ("vmem_capacity_bytes", "vmem_bytes", "vmem_size_bytes"):
            v = getattr(info, attr, None)
            if v:
                return int(v)
    except Exception:
        pass
    return 64 * _MIB


def _pick_lane_width(total):
    """Largest multiple-of-128 divisor of `total` (requires total % 128 == 0)."""
    c = (min(_MAX_LANE_WIDTH, total) // _LANE) * _LANE
    while c >= _LANE:
        if total % c == 0:
            return c
        c -= _LANE
    return _LANE  # unreachable: total is a multiple of 128


def _pick_row_tile(rows, lane_width, itemsize, tile_bytes):
    """Sublane-multiple row tile ~tile_bytes; >= 2 grid programs when possible."""
    max_rows = max(_SUBLANE,
                   (tile_bytes // (lane_width * itemsize)) // _SUBLANE * _SUBLANE)
    if rows > max_rows:
        return max_rows                       # grid >= 2 automatically (cdiv)
    if rows >= 2 * _SUBLANE:
        # Small-but-splittable: cap the tile at ~half the rows so v7x's two
        # TensorCores both participate in the (parallel) copy.
        return max(_SUBLANE, (rows // 2) // _SUBLANE * _SUBLANE)
    return rows                               # tiny: full extent (always legal)


def unflatten(x, block_size):
    """Pallas implementation of UnFlatten.forward.

    x: (B, C, H, W) -> (B, C*H*W // block_size**2, block_size, block_size)

    Note: the HBM reuse from input_output_aliases only materializes when the
    caller's buffer for `x` is donatable inside the enclosing jit; otherwise
    XLA inserts a defensive copy (the op is then one read + one write of x).
    """
    B = x.shape[0]
    feat = 1
    for d in x.shape[1:]:
        feat *= d
    assert feat % (block_size * block_size) == 0, "feature dim not divisible"
    c_out = feat // (block_size * block_size)
    out_shape_4d = (B, c_out, block_size, block_size)

    total = B * feat
    itemsize = jnp.dtype(x.dtype).itemsize

    vmem_cap = _vmem_capacity_bytes()
    tile_bytes = max(_MIB, min(vmem_cap // 8, 8 * _MIB))
    vmem_limit = min(vmem_cap, 64 * _MIB)

    if total % _LANE == 0:
        # Common path: lane-dense 2-D slab, sublane-aligned row tiles.
        lane_width = _pick_lane_width(total)
        rows = total // lane_width
        row_tile = _pick_row_tile(rows, lane_width, itemsize, tile_bytes)
        slab_shape = (rows, lane_width)
        block_shape = (row_tile, lane_width)
        grid = (pl.cdiv(rows, row_tile),)
        index_map = lambda i: (i, 0)
    else:
        # Rare odd path (total not a multiple of 128): single-sublane slab,
        # lane-tiled with a masked edge block via cdiv.  Correct, if not
        # sublane-efficient; only hit by unusual shapes.
        lane_tile = max(_LANE,
                        min((tile_bytes // itemsize) // _LANE * _LANE, total // _LANE * _LANE))
        if total < _LANE:
            lane_tile = total                 # full extent -> always legal
        slab_shape = (1, total)
        block_shape = (1, lane_tile)
        grid = (pl.cdiv(total, lane_tile),)
        index_map = lambda i: (0, i)

    # Row-major flatten to the slab (metadata only).
    x2d = x.reshape(slab_shape)

    out2d = pl.pallas_call(
        _copy_kernel,
        out_shape=jax.ShapeDtypeStruct(slab_shape, x.dtype),
        grid_spec=pltpu.PrefetchScalarGridSpec(
            num_scalar_prefetch=0,
            grid=grid,
            in_specs=[pl.BlockSpec(block_shape, index_map)],
            out_specs=pl.BlockSpec(block_shape, index_map),
        ),
        compiler_params=pltpu.CompilerParams(
            dimension_semantics=("parallel",),   # shard copy across v7x's 2 TCs
            vmem_limit_bytes=vmem_limit,
        ),
        # Pure-bandwidth hint for XLA's scheduler (0 flops, 2x bytes traffic).
        cost_estimate=pl.CostEstimate(
            flops=0, transcendentals=0, bytes_accessed=2 * total * itemsize),
        # Let XLA write the output into the input's HBM buffer when donatable.
        input_output_aliases={0: 0},
    )(x2d)

    # Final 4-D view (metadata only).
    return out2d.reshape(out_shape_4d)


if __name__ == "__main__":
    key = jax.random.PRNGKey(0)
    # Small NCHW input consistent with the module: batch=2, channels=4, 16x16.
    x = jax.random.normal(key, (2, 4, 16, 16), dtype=jnp.float32)
    block_size = 8  # UnFlatten(block_size=8): (2, 4, 16, 16) -> (2, 16, 8, 8)

    out = unflatten(x, block_size)
    out = jax.block_until_ready(out)

    # Reference: exact view semantics (row-major reshape).
    ref = x.reshape(x.shape[0], -1, block_size, block_size)

    assert out.shape == (2, 16, 8, 8), out.shape
    assert out.dtype == x.dtype
    assert jnp.array_equal(out, ref), "mismatch vs. reference reshape"

    # Exercise a larger, non-tile-aligned shape to check the cdiv edge block.
    x2 = jax.random.normal(jax.random.PRNGKey(1), (3, 8, 24, 24), dtype=jnp.float32)
    out2 = jax.block_until_ready(unflatten(x2, 8))
    ref2 = x2.reshape(3, -1, 8, 8)
    assert jnp.array_equal(out2, ref2), "mismatch vs. reference reshape (case 2)"

    print("KERNEL_OK")
</pallas_src>

<mosaic_0001>
module attributes {stable_mosaic.version = 11 : i64} {
  func.func @_copy_kernel(%arg0: i32, %arg1: memref<1x2048xf32, #tpu.memory_space<vmem>>, %arg2: memref<1x2048xf32, #tpu.memory_space<vmem>>) attributes {dimension_semantics = [#tpu.dimension_semantics<parallel>], iteration_bounds = array<i64: 1>, scalar_prefetch = 0 : i64, scratch_operands = 0 : i64, tpu.core_type = #tpu.core_type<tc>, window_params = [{transform_indices = @transform_0, window_bounds = array<i64: 1, 2048>}, {transform_indices = @transform_1, window_bounds = array<i64: 1, 2048>}]} {
    %c0 = arith.constant 0 : index
    %c0_0 = arith.constant 0 : index
    %0 = vector.load %arg1[%c0, %c0_0] : memref<1x2048xf32, #tpu.memory_space<vmem>>, vector<1x2048xf32>
    %c0_1 = arith.constant 0 : index
    %c0_2 = arith.constant 0 : index
    %1 = vector.load %arg2[%c0_1, %c0_2] : memref<1x2048xf32, #tpu.memory_space<vmem>>, vector<1x2048xf32>
    tpu.vector_store %arg2[%c0_1, %c0_2], %0 {strides = array<i32>} : memref<1x2048xf32, #tpu.memory_space<vmem>>, vector<1x2048xf32>,
    return
  }
  func.func @transform_0(%arg0: i32) -> (i32, i32) {
    %c0_i32 = arith.constant 0 : i32
    %c0_i32_0 = arith.constant 0 : i32
    return %arg0, %c0_i32 : i32, i32
  }
  func.func @transform_1(%arg0: i32) -> (i32, i32) {
    %c0_i32 = arith.constant 0 : i32
    %c0_i32_0 = arith.constant 0 : i32
    return %arg0, %c0_i32 : i32, i32
  }
}

</mosaic_0001>

<bundles_post_ra>
// kernel: tpu_custom_call.1
= control target key start
LH: loop header
LB: loop body
LE: loop exit
PB: predicated region body
PF: predicated region fallthrough
CT: control target
= control target key end

     0   :  { %6 = vsyncpa [#allocation3], 0  ;;  %s126_s0 = inlined_call_operand.hbm [shape: f32[1,2048], index: 0, kind: input, shape index: {}, may-alias: {0,1}]   ;;  %s127_s1 = inlined_call_operand.hbm [shape: f32[1,2048], index: 1, kind: output, shape index: {}, may-alias: {0,1}]  }
   0x1   :  { %7 = vsyncpa [#allocation4], 0  ;;  %s90_s6 = smov [#allocation2]   ;;  %s42_s10 = scalar_lea.hbm %s126_s0, 256 }
   0x2   :  { %s14_s7 = sshll.u32 %s90_s6, 4  ;;  %p43_p0 = scmp.ne.s32.totalorder %s126_s0, %s42_s10  ;;  %s15_s7 = int_to_ptr.vmem [resolvable:$true] %s14_s7 }
   0x3   :  { %p46_p1 = scmp.lt.u32.totalorder %s42_s10, %s126_s0 }
   0x5   :  { %p48_p2 = pnand %p46_p1, %p43_p0 }
   0x7   :  { %51 = shalt.err (!%p48_p2)
}
   0x8   :  { %s52_s15 = scalar_lea.vmem %s15_s7, 256  ;;  %p57_p4 = scmp.lt.s32.totalorder %s15_s7, %s15_s7 }
   0x9   :  { %p53_p3 = scmp.ne.s32.totalorder %s15_s7, %s52_s15  ;;  %p58_p5 = scmp.lt.s32.totalorder %s52_s15, %s52_s15 }
   0xb   :  { %p59_p6 = por %p58_p5, %p57_p4 }
   0xd   :  { %p60_p7 = pnand %p59_p6, %p53_p3 }
   0xf   :  { %63 = shalt.err (!%p60_p7)
}
  0x10   :  { %17 = dma.hbm_to_vmem [thread:$0]  %s126_s0, 256, %s15_s7, [#allocation3]  }
  0x11   :  { %86 = dma.done.wait [#allocation3], 256  }
  0x12   :  { %87 = vsyncadd [#allocation3], 4294967040  ;;  %s91_s18 = smov [#allocation5]   ;;  %v21_v0 = vld [vmem:[#allocation2] sm:$0xff]  ;;  %v22_v1 = vld [vmem:[#allocation2 + $0x8] sm:$0xff] }
  0x13   :  { %s31_s19 = sshll.u32 %s91_s18, 4  ;;  %23 = vst [vmem:[#allocation5] sm:$0xff] %v21_v0  ;;  %24 = vst [vmem:[#allocation5 + $0x8] sm:$0xff] %v22_v1  ;;  %s32_s19 = int_to_ptr.vmem [resolvable:$true] %s31_s19 }
  0x14   :  { %s64_s20 = scalar_lea.vmem %s32_s19, 256  ;;  %p69_p9 = scmp.lt.s32.totalorder %s32_s19, %s32_s19 }
  0x15   :  { %p65_p8 = scmp.ne.s32.totalorder %s32_s19, %s64_s20  ;;  %p70_p10 = scmp.lt.s32.totalorder %s64_s20, %s64_s20 }
  0x17   :  { %p71_p11 = por %p70_p10, %p69_p9 }
  0x19   :  { %p72_p12 = pnand %p71_p11, %p65_p8 }
  0x1b   :  { %75 = shalt.err (!%p72_p12)
}
  0x1c   :  { %s76_s0 = scalar_lea.hbm %s127_s1, 256 }
  0x1d   :  { %p77_p13 = scmp.ne.s32.totalorder %s127_s1, %s76_s0  ;;  %p80_p0 = scmp.lt.u32.totalorder %s76_s0, %s127_s1 }
  0x1f   :  { %p82_p1 = pnand %p80_p0, %p77_p13 }
  0x21   :  { %85 = shalt.err (!%p82_p1)
}
  0x22   :  { %34 = dma.vmem_to_hbm [thread:$0]  %s32_s19, 256, %s127_s1, [#allocation4]  }
  0x23   :  { %88 = dma.done.wait [#allocation4], 256  }
  0x24   :  { %89 = vsyncadd [#allocation4], 4294967040 }
  0x25   :  { %38 = vsyncpa [#allocation3], 1 }
  0x26   :  { %39 = vsyncpa [#allocation4], 1 }

</bundles_post_ra>
